<compile_context>
chip_gen: v7x
topology: tpu7x:2x2x1
jax: 0.10.0
libtpu: 0.0.40
codegen_flags: <defaults>
</compile_context>

<pallas_src>
import functools

import jax
import jax.numpy as jnp
from jax.experimental import pallas as pl
from jax.experimental.pallas import tpu as pltpu

LANE_CHUNK = 512          # in-kernel lane chunk: keeps (r, chunk) temporaries small
_MIB = 1024 * 1024


def ffn_kernel(x_ref, w1_ref, w2_ref, b1_ref, b2_ref, o_ref, *, bf16_act):
    block_l = x_ref.shape[-1]
    chunk = min(LANE_CHUNK, block_l)
    n_chunks = block_l // chunk

    # Weights / biases loaded once per grid step (resident, single-buffered).
    w1 = w1_ref[...]                     # (r, d) bf16
    w2 = w2_ref[...]                     # (d, r) bf16
    b1 = b1_ref[...]                     # (r, 1) f32
    b2 = b2_ref[...]                     # (d, 1) f32
    b1v = b1.astype(jnp.bfloat16) if bf16_act else b1

    def compute(x):
        # x: (d, chunk) f32.  bf16 MXU inputs, f32 accumulation.
        h = jnp.dot(w1, x.astype(jnp.bfloat16),
                    preferred_element_type=jnp.float32)          # (r, chunk) f32
        hb = h.astype(jnp.bfloat16) if bf16_act else h           # bf16 VALU on v6e/v7x
        act = jnp.maximum(hb + b1v, 0).astype(jnp.bfloat16)      # (r, chunk) bf16
        y = jnp.dot(w2, act, preferred_element_type=jnp.float32)  # (d, chunk) f32
        return x + y + b2                                        # f32 residual

    if n_chunks == 1:
        o_ref[...] = compute(x_ref[...])
    else:
        def body(c, carry):
            start = pl.multiple_of(c * chunk, 128)
            o_ref[:, pl.ds(start, chunk)] = compute(x_ref[:, pl.ds(start, chunk)])
            return carry
        jax.lax.fori_loop(0, n_chunks, body, 0, unroll=True)


def _device_info():
    """(usable_vmem_bytes, num_tensorcores, is_v7, bf16_act)."""
    kind = ""
    try:
        kind = jax.devices()[0].device_kind.lower()
    except Exception:
        pass
    two_tc = ("v7" in kind) or ("7x" in kind)
    vmem_bytes = None
    try:
        vmem_bytes = int(pltpu.get_tpu_info().vmem_capacity_bytes)
    except Exception:
        vmem_bytes = None
    if vmem_bytes is None:
        vmem_bytes = 64 * _MIB if two_tc else 128 * _MIB
    usable = int(vmem_bytes * 0.75)          # headroom for compiler scratch
    bf16_act = ("v6" in kind) or two_tc      # bf16 VALU on v6e / v7x only
    return usable, (2 if two_tc else 1), two_tc, bf16_act


def _vmem_need(d, r, block_l):
    """Bytes of VMEM for one grid step at lane block `block_l`."""
    f32, bf16 = 4, 2
    chunk = min(block_l, LANE_CHUNK)
    return (2 * d * block_l * f32        # x block, double-buffered
            + 2 * d * block_l * f32      # out block, double-buffered
            + 2 * r * d * bf16           # W_1 + W_2 (bf16), single-buffered
            + (r + d) * f32              # biases, single-buffered
            + r * chunk * (f32 + bf16)   # h (f32) + act (bf16) intermediates
            + d * chunk * f32)           # y intermediate


def _chunk_ok(block_l):
    return block_l <= LANE_CHUNK or block_l % LANE_CHUNK == 0


def _pick_lane_block(total_l, d, r, usable_vmem):
    """Largest multiple of 128 dividing total_l that fits the VMEM budget."""
    best = 128
    cand = 128
    while cand <= total_l:
        if (total_l % cand == 0 and _chunk_ok(cand)
                and _vmem_need(d, r, cand) <= usable_vmem):
            best = cand
        cand += 128
    return best


def _maybe_halve_for_megacore(block_l, n_steps, num_tc):
    """Only split to get >=2 grid steps on 2-TC parts (v7x)."""
    if num_tc >= 2 and n_steps < num_tc and block_l >= 256:
        half = block_l // 2
        if half % 128 == 0 and _chunk_ok(half):
            return half
    return block_l


def _vmem_limit(vmem_need, is_v7):
    cap = 56 * _MIB if is_v7 else 100 * _MIB
    return int(min(cap, max(vmem_need * 1.5, 16 * _MIB)))


def ffn_forward(x, w1, w2, b1, b2):
    """x: (N, d, n) float32.  w1: (r, d), w2: (d, r) (f32 or pre-cast bf16).

    Returns (N, d, n) float32, matching the PyTorch module's forward.
    """
    N, d, n = x.shape
    r = w1.shape[0]
    usable_vmem, num_tc, is_v7, bf16_act = _device_info()

    # Weight cast is a no-op when the caller pre-cast (hoisted) bf16 weights.
    w1_bf = w1 if w1.dtype == jnp.bfloat16 else w1.astype(jnp.bfloat16)
    w2_bf = w2 if w2.dtype == jnp.bfloat16 else w2.astype(jnp.bfloat16)
    b1_2d = b1.reshape(r, 1).astype(jnp.float32)
    b2_2d = b2.reshape(d, 1).astype(jnp.float32)

    kernel = functools.partial(ffn_kernel, bf16_act=bf16_act)

    if n % 128 == 0:
        # ---- Direct path: no wrapper transpose, lane axis stays n. ----
        block_n = _pick_lane_block(n, d, r, usable_vmem)
        block_n = _maybe_halve_for_megacore(block_n, N * (n // block_n), num_tc)
        vmem_need = _vmem_need(d, r, block_n)
        assert vmem_need <= usable_vmem, (
            f"FFN block does not fit VMEM: need {vmem_need} B, have {usable_vmem} B")

        grid = (N, n // block_n)
        lanes_total = N * n
        cost = pl.CostEstimate(
            flops=4 * d * r * lanes_total,
            transcendentals=0,
            bytes_accessed=2 * d * lanes_total * 4 + 2 * r * d * 2 + (r + d) * 4)

        return pl.pallas_call(
            kernel,
            out_shape=jax.ShapeDtypeStruct((N, d, n), jnp.float32),
            grid_spec=pltpu.PrefetchScalarGridSpec(
                num_scalar_prefetch=0,
                grid=grid,
                in_specs=[
                    pl.BlockSpec((pl.Squeezed(), d, block_n),
                                 lambda b, j: (b, 0, j)),
                    pl.BlockSpec((r, d), lambda b, j: (0, 0),
                                 pipeline_mode=pl.Buffered(1)),
                    pl.BlockSpec((d, r), lambda b, j: (0, 0),
                                 pipeline_mode=pl.Buffered(1)),
                    pl.BlockSpec((r, 1), lambda b, j: (0, 0),
                                 pipeline_mode=pl.Buffered(1)),
                    pl.BlockSpec((d, 1), lambda b, j: (0, 0),
                                 pipeline_mode=pl.Buffered(1)),
                ],
                out_specs=pl.BlockSpec((pl.Squeezed(), d, block_n),
                                       lambda b, j: (b, 0, j)),
            ),
            compiler_params=pltpu.CompilerParams(
                dimension_semantics=("parallel", "parallel"),
                vmem_limit_bytes=_vmem_limit(vmem_need, is_v7)),
            cost_estimate=cost,
        )(x, w1_bf, w2_bf, b1_2d, b2_2d)

    # ---- Fallback path (n not a multiple of 128): merge batch into lanes. ----
    L = N * n
    x2 = jnp.transpose(x, (1, 0, 2)).reshape(d, L)
    Lp = ((L + 127) // 128) * 128
    if Lp != L:
        x2 = jnp.pad(x2, ((0, 0), (0, Lp - L)))

    block_L = _pick_lane_block(Lp, d, r, usable_vmem)
    block_L = _maybe_halve_for_megacore(block_L, Lp // block_L, num_tc)
    vmem_need = _vmem_need(d, r, block_L)
    assert vmem_need <= usable_vmem, (
        f"FFN block does not fit VMEM: need {vmem_need} B, have {usable_vmem} B")

    cost = pl.CostEstimate(
        flops=4 * d * r * Lp,
        transcendentals=0,
        bytes_accessed=2 * d * Lp * 4 + 2 * r * d * 2 + (r + d) * 4)

    out2 = pl.pallas_call(
        kernel,
        out_shape=jax.ShapeDtypeStruct((d, Lp), jnp.float32),
        grid_spec=pltpu.PrefetchScalarGridSpec(
            num_scalar_prefetch=0,
            grid=(Lp // block_L,),
            in_specs=[
                pl.BlockSpec((d, block_L), lambda i: (0, i)),
                pl.BlockSpec((r, d), lambda i: (0, 0),
                             pipeline_mode=pl.Buffered(1)),
                pl.BlockSpec((d, r), lambda i: (0, 0),
                             pipeline_mode=pl.Buffered(1)),
                pl.BlockSpec((r, 1), lambda i: (0, 0),
                             pipeline_mode=pl.Buffered(1)),
                pl.BlockSpec((d, 1), lambda i: (0, 0),
                             pipeline_mode=pl.Buffered(1)),
            ],
            out_specs=pl.BlockSpec((d, block_L), lambda i: (0, i)),
        ),
        compiler_params=pltpu.CompilerParams(
            dimension_semantics=("parallel",),
            vmem_limit_bytes=_vmem_limit(vmem_need, is_v7)),
        cost_estimate=cost,
    )(x2, w1_bf, w2_bf, b1_2d, b2_2d)

    out = out2[:, :L].reshape(d, N, n)
    return jnp.transpose(out, (1, 0, 2))


if __name__ == "__main__":
    # Small shapes consistent with the module: x is (N, d, n).
    N, d, r, n = 2, 32, 64, 128

    key = jax.random.PRNGKey(0)
    kx, kw1, kw2, kb1, kb2 = jax.random.split(key, 5)

    x = jax.random.normal(kx, (N, d, n), dtype=jnp.float32)
    # Parameter scales matching the module's __init__ (W ~ randn * 0.01).
    w1 = jax.random.normal(kw1, (r, d), dtype=jnp.float32) * 0.01
    w2 = jax.random.normal(kw2, (d, r), dtype=jnp.float32) * 0.01
    # Nonzero biases so the bias path is exercised (module inits them to zero,
    # but the forward must be correct for any parameter values).
    b1 = jax.random.normal(kb1, (r,), dtype=jnp.float32) * 0.1
    b2 = jax.random.normal(kb2, (d,), dtype=jnp.float32) * 0.1

    # One-time (hoisted) bf16 weight cast, standing in for cached bf16 params:
    # the per-call forward does no weight dtype conversion.
    w1_bf = w1.astype(jnp.bfloat16)
    w2_bf = w2.astype(jnp.bfloat16)

    out = jax.block_until_ready(ffn_forward(x, w1_bf, w2_bf, b1, b2))

    # Pure-JAX f32 reference (bf16 MXU inputs => ~1e-3 abs deviation expected).
    act_ref = jax.nn.relu(jnp.einsum("rd,Ndn->Nrn", w1, x) + b1[None, :, None])
    out_ref = x + jnp.einsum("dr,Nrn->Ndn", w2, act_ref) + b2[None, :, None]
    assert out.shape == (N, d, n)
    max_err = float(jnp.max(jnp.abs(out - out_ref)))
    assert jnp.allclose(out, out_ref, atol=2e-3, rtol=2e-3), max_err

    print("KERNEL_OK")
</pallas_src>

<mosaic_0001>
module attributes {stable_mosaic.version = 11 : i64} {
  func.func @ffn_kernel(%arg0: i32, %arg1: i32, %arg2: memref<1x32x128xf32, #tpu.memory_space<vmem>>, %arg3: memref<64x32xbf16, #tpu.memory_space<vmem>>, %arg4: memref<32x64xbf16, #tpu.memory_space<vmem>>, %arg5: memref<64x1xf32, #tpu.memory_space<vmem>>, %arg6: memref<32x1xf32, #tpu.memory_space<vmem>>, %arg7: memref<1x32x128xf32, #tpu.memory_space<vmem>>) attributes {dimension_semantics = [#tpu.dimension_semantics<parallel>, #tpu.dimension_semantics<parallel>], iteration_bounds = array<i64: 2, 1>, scalar_prefetch = 0 : i64, scratch_operands = 0 : i64, tpu.core_type = #tpu.core_type<tc>, window_params = [{transform_indices = @transform_0, window_bounds = array<i64: 1, 32, 128>}, {pipeline_mode = #tpu.pipeline_mode<synchronous>, transform_indices = @transform_1, window_bounds = array<i64: 64, 32>}, {pipeline_mode = #tpu.pipeline_mode<synchronous>, transform_indices = @transform_2, window_bounds = array<i64: 32, 64>}, {pipeline_mode = #tpu.pipeline_mode<synchronous>, transform_indices = @transform_3, window_bounds = array<i64: 64, 1>}, {pipeline_mode = #tpu.pipeline_mode<synchronous>, transform_indices = @transform_4, window_bounds = array<i64: 32, 1>}, {transform_indices = @transform_5, window_bounds = array<i64: 1, 32, 128>}]} {
    %c0 = arith.constant 0 : index
    %c0_0 = arith.constant 0 : index
    %0 = vector.load %arg3[%c0, %c0_0] : memref<64x32xbf16, #tpu.memory_space<vmem>>, vector<64x32xbf16>
    %c0_1 = arith.constant 0 : index
    %c0_2 = arith.constant 0 : index
    %1 = vector.load %arg4[%c0_1, %c0_2] : memref<32x64xbf16, #tpu.memory_space<vmem>>, vector<32x64xbf16>
    %c0_3 = arith.constant 0 : index
    %c0_4 = arith.constant 0 : index
    %2 = vector.load %arg5[%c0_3, %c0_4] : memref<64x1xf32, #tpu.memory_space<vmem>>, vector<64x1xf32>
    %c0_5 = arith.constant 0 : index
    %c0_6 = arith.constant 0 : index
    %3 = vector.load %arg6[%c0_5, %c0_6] : memref<32x1xf32, #tpu.memory_space<vmem>>, vector<32x1xf32>
    %c0_7 = arith.constant 0 : index
    %c0_8 = arith.constant 0 : index
    %c0_9 = arith.constant 0 : index
    %4 = vector.load %arg2[%c0_7, %c0_8, %c0_9] : memref<1x32x128xf32, #tpu.memory_space<vmem>>, vector<1x32x128xf32>
    %5 = vector.shape_cast %4 : vector<1x32x128xf32> to vector<32x128xf32>
    %6 = arith.truncf %5 : vector<32x128xf32> to vector<32x128xbf16>
    %cst = arith.constant dense<0.000000e+00> : vector<64x128xf32>
    %7 = tpu.matmul %0, %6, %cst {dimension_numbers = #tpu.dot_dimension_numbers<[1], [0], [0], [1], [0, 0, 1, 1], [], []>} : vector<64x32xbf16>, vector<32x128xbf16>, vector<64x128xf32> -> vector<64x128xf32>
    %8 = vector.broadcast %2 : vector<64x1xf32> to vector<64x128xf32>
    %9 = arith.addf %7, %8 : vector<64x128xf32>
    %cst_10 = arith.constant 0.000000e+00 : f32
    %10 = vector.broadcast %cst_10 : f32 to vector<64x128xf32>
    %11 = arith.maximumf %9, %10 : vector<64x128xf32>
    %12 = arith.truncf %11 : vector<64x128xf32> to vector<64x128xbf16>
    %cst_11 = arith.constant dense<0.000000e+00> : vector<32x128xf32>
    %13 = tpu.matmul %1, %12, %cst_11 {dimension_numbers = #tpu.dot_dimension_numbers<[1], [0], [0], [1], [0, 0, 1, 1], [], []>} : vector<32x64xbf16>, vector<64x128xbf16>, vector<32x128xf32> -> vector<32x128xf32>
    %14 = arith.addf %5, %13 : vector<32x128xf32>
    %15 = vector.broadcast %3 : vector<32x1xf32> to vector<32x128xf32>
    %16 = arith.addf %14, %15 : vector<32x128xf32>
    %c0_12 = arith.constant 0 : index
    %c0_13 = arith.constant 0 : index
    %c0_14 = arith.constant 0 : index
    %17 = vector.load %arg7[%c0_12, %c0_13, %c0_14] : memref<1x32x128xf32, #tpu.memory_space<vmem>>, vector<1x32x128xf32>
    %18 = vector.shape_cast %17 : vector<1x32x128xf32> to vector<32x128xf32>
    %19 = vector.shape_cast %16 : vector<32x128xf32> to vector<1x32x128xf32>
    tpu.vector_store %arg7[%c0_12, %c0_13, %c0_14], %19 {strides = array<i32>} : memref<1x32x128xf32, #tpu.memory_space<vmem>>, vector<1x32x128xf32>,
    return
  }
  func.func @transform_0(%arg0: i32, %arg1: i32) -> (i32, i32, i32) {
    %c0_i32 = arith.constant 0 : i32
    %c0_i32_0 = arith.constant 0 : i32
    return %arg0, %c0_i32, %arg1 : i32, i32, i32
  }
  func.func @transform_1(%arg0: i32, %arg1: i32) -> (i32, i32) {
    %c0_i32 = arith.constant 0 : i32
    %c0_i32_0 = arith.constant 0 : i32
    %c0_i32_1 = arith.constant 0 : i32
    return %c0_i32, %c0_i32_0 : i32, i32
  }
  func.func @transform_2(%arg0: i32, %arg1: i32) -> (i32, i32) {
    %c0_i32 = arith.constant 0 : i32
    %c0_i32_0 = arith.constant 0 : i32
    %c0_i32_1 = arith.constant 0 : i32
    return %c0_i32, %c0_i32_0 : i32, i32
  }
  func.func @transform_3(%arg0: i32, %arg1: i32) -> (i32, i32) {
    %c0_i32 = arith.constant 0 : i32
    %c0_i32_0 = arith.constant 0 : i32
    %c0_i32_1 = arith.constant 0 : i32
    return %c0_i32, %c0_i32_0 : i32, i32
  }
  func.func @transform_4(%arg0: i32, %arg1: i32) -> (i32, i32) {
    %c0_i32 = arith.constant 0 : i32
    %c0_i32_0 = arith.constant 0 : i32
    %c0_i32_1 = arith.constant 0 : i32
    return %c0_i32, %c0_i32_0 : i32, i32
  }
  func.func @transform_5(%arg0: i32, %arg1: i32) -> (i32, i32, i32) {
    %c0_i32 = arith.constant 0 : i32
    %c0_i32_0 = arith.constant 0 : i32
    return %arg0, %c0_i32, %arg1 : i32, i32, i32
  }
}

</mosaic_0001>

<bundles_post_ra>
// kernel: tpu_custom_call.1
= control target key start
LH: loop header
LB: loop body
LE: loop exit
PB: predicated region body
PF: predicated region fallthrough
CT: control target
= control target key end

     0   :  { %10 = vsyncpa [#allocation3], 0  ;;  %s1054_s0 = inlined_call_operand.vmem [shape: f32[2,32,128], index: 0, kind: input, shape index: {}]   ;;  %s1055_s1 = inlined_call_operand.vmem [shape: bf16[64,32], index: 1, kind: input, shape index: {}]   ;;  %s1056_s2 = inlined_call_operand.vmem [shape: bf16[32,64], index: 2, kind: input, shape index: {}]   ;;  %s1057_s3 = inlined_call_operand.vmem [shape: f32[64,1], index: 3, kind: input, shape index: {}]   ;;  %s1058_s4 = inlined_call_operand.vmem [shape: f32[32,1], index: 4, kind: input, shape index: {}]   ;;  %s1059_s5 = inlined_call_operand.hbm [shape: f32[2,32,128], index: 5, kind: output, shape index: {}]  }
   0x1   :  { %12 = vsyncpa [#allocation3 + $0x1], 0  ;;  %s863_s18 = smov 0   ;;  %s865_s19 = smov 0  }
   0x2   :  { %s867_s20 = smov 0   ;;  %s869_s21 = smov 0  }
   0x3   :  { %s871_s22 = smov 0   ;;  %s873_s23 = smov 0  }
   0x4 LB: > { %s620_s24 = sadd.s32 4294967295, %s827_s23   ;;  %s621_s25 = sadd.s32 4294967294, %s827_s23   ;;  %s827_s23 = sphi %s873_s23, %s18_s23   ;;  %s823_s22 = sphi %s871_s22, %s1066_s22   ;;  %s819_s21 = sphi %s869_s21, %s1065_s21   ;;  %s815_s20 = sphi %s867_s20, %s1064_s20   ;;  %s811_s19 = sphi %s865_s19, %s1063_s19   ;;  %s807_s18 = sphi %s863_s18, %s1062_s18  }
   0x5   : > { %s30_s26 = sadd.s32 1, %s823_s22  ;;  %s151_s27 = sadd.s32 1, %s815_s20 }
   0x6   : > { %p32_p0 = scmp.ge.s32.totalorder %s30_s26, 2  ;;  %p161_p1 = scmp.ne.s32.totalorder %s815_s20, %s811_s19 }
   0x7   : > { %p162_p2 = scmp.eq.s32.totalorder %s620_s24, 1  ;;  %p167_p3 = scmp.ne.s32.totalorder %s811_s19, %s807_s18 }
   0x8   : > { %s1068_s26 = smov (%p32_p0, %s30_s26), 0  ;;  %p168_p5 = scmp.eq.s32.totalorder %s621_s25, 1 }
   0x9   : > { %p903_p4 = por %p162_p2, %p161_p1  ;;  %s146_s29 = ssub.s32 %s823_s22, %s1068_s26 }
   0xa   : > { %p624_p6 = scmp.ge.s32.totalorder %s827_s23, 1  ;;  %p149_p7 = scmp.eq.s32.totalorder %s146_s29, 0 }
   0xb   : > { %p910_p8 = por %p168_p5, %p167_p3  ;;  %p209_p9 = scmp.lt.s32.totalorder %s827_s23, 3 }
   0xc   : > { %s916_s6 = scalar_select %p149_p7, %s815_s20, %s151_s27  }
   0xd   : > { %p210_p10 = pnand %p624_p6, %p209_p9 }
   0xe   : > { %p240_p11 = scmp.lt.s32.totalorder (!%p210_p10), %s819_s21, 1  ;;  %v743_v0 = vld [vmem:[%s1055_s1] sm:$0xff] (!%p210_p10)   ;;  %vm339_vm0 = vcmask (!%p210_p10), 261120   ;;  %v829_v1 = vmov (!%p210_p10), 0   ;;  %v263_v3 = vld [vmem:[%s1057_s3 + $0x10] sm:$0xff] (!%p210_p10)  ;;  %v262_v4 = vld [vmem:[%s1057_s3 + $0x8] sm:$0xff] (!%p210_p10) }
   0xf   : > { %213 = sbr.rel (%p210_p10) target bundleno = 508 (0x1fc), region = 40  ;;  %663 = vmatprep.mubr.msk.bf16.mxu0 (!%p210_p10), %vm339_vm0, %v743_v0  ;;  %741 = vset.pattern.permute.xlu0 (!%p210_p10), %v829_v1  ;;  %v261_v2 = vld [vmem:[%s1057_s3] sm:$0xff] (!%p210_p10)  ;;  %v264_v10 = vld [vmem:[%s1057_s3 + $0x18] sm:$0xff] (!%p210_p10)  ;;  %v266_v13 = vld [vmem:[%s1057_s3 + $0x28] sm:$0xff] (!%p210_p10)  ;;  %vm439_vm1 = vcmask (!%p210_p10), 523264   ;;  %s237_s24 = sand.u32 (!%p210_p10), 1, %s811_s19  }
  0x10   : > { %742 = vset.pattern.permute.xlu1 (!%p210_p10), %v829_v1  ;;  %281 = vperm.xlu0 (!%p210_p10), %741, %v261_v2   ;;  %v265_v12 = vld [vmem:[%s1057_s3 + $0x20] sm:$0xff] (!%p210_p10)  ;;  %v744_v14 = vld [vmem:[%s1055_s1 + $0x8] sm:$0xff] (!%p210_p10)   ;;  %v745_v15 = vld [vmem:[%s1055_s1 + $0x10] sm:$0xff] (!%p210_p10)   ;;  %s625_s25 = sshll.u32 (!%p210_p10), %s237_s24, 5  ;;  %s646_s7 = sshll.u32 (!%p210_p10), %s819_s21, 9 }
  0x11   : > { %291 = vperm.xlu1 (!%p210_p10), %742, %v263_v3   ;;  %v267_v16 = vld [vmem:[%s1057_s3 + $0x30] sm:$0xff] (!%p210_p10)  ;;  %v268_v17 = vld [vmem:[%s1057_s3 + $0x38] sm:$0xff] (!%p210_p10)  ;;  %v269_v18 = vld [vmem:[%s1058_s4] sm:$0xff] (!%p210_p10)  ;;  %s239_s27 = scalar_lea.vmem (!%p210_p10), [#allocation2], %s625_s25  ;;  %s830_s12 = smov (!%p210_p10), [#allocation2]  }
  0x12   : > { %v270_v19 = vld [vmem:[%s1058_s4 + $0x8] sm:$0xff] (!%p210_p10)  ;;  %v746_v20 = vld [vmem:[%s1055_s1 + $0x18] sm:$0xff] (!%p210_p10)   ;;  %v271_v21 = vld [vmem:[%s1058_s4 + $0x10] sm:$0xff] (!%p210_p10)  ;;  %s542_s29 = sshll.u32 (!%p210_p10), %s239_s27, 4  ;;  %s753_s13 = sshll.u32 (!%p210_p10), %s830_s12, 4  ;;  %s1001_s29 = int_to_ptr.vmem [resolvable:$true] %s542_s29  ;;  %s754_s13 = int_to_ptr.vmem [resolvable:$false] %s753_s13 }
  0x13   : > { %v272_v22 = vld [vmem:[%s1058_s4 + $0x18] sm:$0xff] (!%p210_p10)  ;;  %v747_v23 = vld [vmem:[%s1056_s2] sm:$0xff] (!%p210_p10)   ;;  %v748_v60 = vld [vmem:[%s1056_s2 + $0x8] sm:$0xff] (!%p210_p10)   ;;  %s749_s11 = scalar_lea.vmem (!%p210_p10), %s1001_s29, 512  ;;  %s755_s14 = scalar_lea.vmem (!%p210_p10), %s754_s13, 1024 }
  0x14   : > { %286 = vperm.xlu0 (!%p210_p10), %741, %v262_v4   ;;  %679 = vmatprep.mubr.msk.bf16.mxu1 (!%p210_p10), %vm439_vm1, %v747_v23  ;;  %p750_p12 = scmp.ne.s32.totalorder (!%p210_p10), %s1001_s29, %s749_s11  ;;  %p756_p1 = scmp.lt.s32.totalorder (!%p210_p10), %s1001_s29, %s754_s13 }
  0x15   : > { %296 = vperm.xlu1 (!%p210_p10), %742, %v264_v10   ;;  %p757_p2 = scmp.lt.s32.totalorder (!%p210_p10), %s755_s14, %s749_s11 }
  0x16   : > { %s241_s9 = scalar_select %p240_p11, %s819_s21, 1 }
  0x17   : > { %s1006_s21 = scalar_lea.hbm %s1059_s5, %s646_s7  ;;  %p751_p13 = pnand %p750_p12, %p903_p4 }
  0x18   : > { %s645_s10 = sshll.u32 %s241_s9, 5  ;;  %301 = vperm.xlu0 %741, %v265_v12   ;;  %p758_p3 = por %p757_p2, %p756_p1 }
  0x19   : > { %s247_s17 = scalar_lea.vmem %s1054_s0, %s645_s10  ;;  %306 = vperm.xlu1 %742, %v266_v13   ;;  %s1008_s10 = scalar_lea.sflag [#allocation3], %s237_s24 }
  0x1a   : > { %v936_v5 = vld [vmem:[%s247_s17] sm:$0xff]  ;;  %v938_v6 = vld [vmem:[%s247_s17 + $0x8] sm:$0xff]  ;;  %v940_v7 = vld [vmem:[%s247_s17 + $0x10] sm:$0xff]  ;;  %p752_p0 = pneg %p751_p13 }
  0x1b   : > { %v277_v8 = vpack.c.bf16 %v938_v6, %v936_v5  ;;  %v944_v9 = vld [vmem:[%s247_s17 + $0x18] sm:$0xff] }
  0x1c   : > { %v278_v11 = vpack.c.bf16 %v944_v9, %v940_v7  ;;  %311 = vperm.xlu0 %741, %v267_v16   ;;  %p759_p5 = pnand %p758_p3, %p752_p0 }
  0x1d   : > { %659 = vmatprep.subr.bf16.mxu0 %v277_v8  ;;  %316 = vperm.xlu1 %742, %v268_v17  }
  0x1e   : > { %660 = vmatpush3.bf16.msra.mxu0 %v277_v8 }
  0x1f   : > { %661 = vmatprep.subr.bf16.mxu0 %v278_v11 }
  0x20   : > { %501 = vperm.xlu0 %741, %v269_v18  }
  0x21   : > { %506 = vperm.xlu1 %742, %v270_v19  }
  0x22   : > { %662 = vmatpush3.bf16.msra.mxu0 %v278_v11 }
  0x24   : > { %511 = vperm.xlu0 %741, %v271_v21  }
  0x25   : > { %664 = vmatmul.mubr.msk.bf16.vlgmr.msra.gmra.mrb[0].mxu0 %vm339_vm0, %v744_v14  ;;  %516 = vperm.xlu1 %742, %v272_v22  }
  0x26   : > { %667 = vmatprep.mubr.msk.bf16.mxu0 %vm339_vm0, %v745_v15 }
  0x2d   : > { %668 = vmatmul.mubr.msk.bf16.gmra.mrb[4].mxu0 %vm339_vm0, %v746_v20 }
  0x8f   : > { %v282_v24 = vpop.permute.xlu0 %281 }
  0x90   : > { %v292_v25 = vpop.permute.xlu1 %291 }
  0x93   : > { %v287_v26 = vpop.permute.xlu0 %286 }
  0x94   : > { %v297_v27 = vpop.permute.xlu1 %296 }
  0x97   : > { %v302_v31 = vpop.permute.xlu0 %301 }
  0x98   : > { %v307_v36 = vpop.permute.xlu1 %306 }
  0x9b   : > { %v312_v43 = vpop.permute.xlu0 %311 }
  0x9c   : > { %v317_v48 = vpop.permute.xlu1 %316 }
  0x9f   : > { %v502_v61 = vpop.permute.xlu0 %501 }
  0xa0   : > { %v507_v62 = vpop.permute.xlu1 %506 }
  0xa3   : > { %v512_v2 = vpop.permute.xlu0 %511 }
  0xa4   : > { %v517_v12 = vpop.permute.xlu1 %516 }
  0xf8   : > { %v665_v28 = vpop.f32.mrb[0].mxu0 }
  0xf9   : > { %v395_v29 = vadd.f32 %v665_v28, %v292_v25  ;;  %v386_v30 = vpop.f32.mrb[1].mxu0 }
  0xfa   : > { %v387_v32 = vadd.f32 %v386_v30, %v282_v24  ;;  %v666_v33 = vpop.f32.mrb[2].mxu0 }
  0xfb   : > { %v398_v34 = vadd.f32 %v666_v33, %v297_v27  ;;  %v389_v35 = vpop.f32.mrb[3].mxu0  ;;  %v419_v38 = vmax.f32 %v395_v29, 0.0 }
  0xfc   : > { %v390_v37 = vadd.f32 %v389_v35, %v287_v26  ;;  %v417_v40 = vmax.f32 %v387_v32, 0.0 }
  0xfd   : > { %v420_v39 = vmax.f32 %v398_v34, 0.0 }
  0xfe   : > { %v418_v41 = vmax.f32 %v390_v37, 0.0 }
  0xff   : > { %v426_v42 = vpack.c.bf16 %v420_v39, %v419_v38 }
 0x100   : > { %v669_v44 = vpop.f32.mrb[4].mxu0  ;;  %v425_v45 = vpack.c.bf16 %v418_v41, %v417_v40 }
 0x101   : > { %v411_v46 = vadd.f32 %v669_v44, %v312_v43  ;;  %v402_v47 = vpop.f32.mrb[5].mxu0 }
 0x102   : > { %v403_v49 = vadd.f32 %v402_v47, %v302_v31  ;;  %v670_v50 = vpop.f32.mrb[6].mxu0  ;;  %671 = vmatprep.subr.bf16.mxu1 %v425_v45 }
 0x103   : > { %v414_v51 = vadd.f32 %v670_v50, %v317_v48  ;;  %v405_v52 = vpop.f32.mrb[7].mxu0  ;;  %672 = vmatpush3.bf16.msra.mxu1 %v425_v45  ;;  %v423_v54 = vmax.f32 %v411_v46, 0.0 }
 0x104   : > { %v406_v53 = vadd.f32 %v405_v52, %v307_v36  ;;  %673 = vmatprep.subr.bf16.mxu1 %v426_v42  ;;  %v421_v56 = vmax.f32 %v403_v49, 0.0 }
 0x105   : > { %v424_v55 = vmax.f32 %v414_v51, 0.0 }
 0x106   : > { %v422_v57 = vmax.f32 %v406_v53, 0.0 }
 0x107   : > { %v428_v58 = vpack.c.bf16 %v424_v55, %v423_v54  ;;  %674 = vmatpush3.bf16.msra.mxu1 %v426_v42 }
 0x108   : > { %v427_v59 = vpack.c.bf16 %v422_v57, %v421_v56 }
 0x10a   : > { %675 = vmatprep.subr.bf16.mxu1 %v427_v59 }
 0x10b   : > { %676 = vmatpush3.bf16.msra.mxu1 %v427_v59 }
 0x10c   : > { %677 = vmatprep.subr.bf16.mxu1 %v428_v58 }
 0x10f   : > { %678 = vmatpush3.bf16.msra.mxu1 %v428_v58 }
 0x112   : > { %680 = vmatmul.mubr.msk.bf16.vlgmr.msra.gmra.mrb[0].mxu1 %vm439_vm1, %v748_v60 }
 0x1e5   : > { %v681_v63 = vpop.f32.mrb[0].mxu1 }
 0x1e6   : > { %v497_v0 = vadd.f32 %v681_v63, %v940_v7  ;;  %v480_v1 = vpop.f32.mrb[1].mxu1 }
 0x1e7   : > { %v495_v3 = vadd.f32 %v480_v1, %v936_v5  ;;  %v682_v4 = vpop.f32.mrb[2].mxu1 }
 0x1e8   : > { %v521_v8 = vadd.f32 %v512_v2, %v497_v0  ;;  %v498_v10 = vadd.f32 %v682_v4, %v944_v9  ;;  %v483_v11 = vpop.f32.mrb[3].mxu1 }
 0x1e9   : > { %v519_v13 = vadd.f32 %v502_v61, %v495_v3  ;;  %v496_v14 = vadd.f32 %v483_v11, %v938_v6 }
 0x1ea   : > { %525 = vst [vmem:[%s239_s27 + $0x10] sm:$0xff] %v521_v8  ;;  %v522_v7 = vadd.f32 %v517_v12, %v498_v10 }
 0x1eb   : > { %523 = vst [vmem:[%s239_s27] sm:$0xff] %v519_v13  ;;  %v520_v5 = vadd.f32 %v507_v62, %v496_v14 }
 0x1ec   : > { %526 = vst [vmem:[%s239_s27 + $0x18] sm:$0xff] %v522_v7 }
 0x1ed   : > { %524 = vst [vmem:[%s239_s27 + $0x8] sm:$0xff] %v520_v5 }
 0x1ee   : > { %762 = shalt.err (!%p759_p5)
}
 0x1ef   : > { %s763_s15 = scalar_lea.hbm %s1006_s21, 512  ;;  %s767_s24 = scalar_lea.hbm %s1059_s5, 1024 }
 0x1f0   : > { %p764_p6 = scmp.ne.s32.totalorder %s1006_s21, %s763_s15  ;;  %p768_p10 = scmp.lt.u32.totalorder %s1006_s21, %s1059_s5 }
 0x1f1   : > { %p769_p11 = scmp.lt.u32.totalorder %s767_s24, %s763_s15  ;;  %p771_p13 = scmp.lt.u32.totalorder %s763_s15, %s1006_s21 }
 0x1f2   : > { %p765_p7 = pnand %p764_p6, %p903_p4 }
 0x1f3   : > { %p770_p12 = por %p769_p11, %p768_p10 }
 0x1f4   : > { %p766_p9 = pneg %p765_p7 }
 0x1f5   : > { %p772_p0 = por %p771_p13, %p770_p12 }
 0x1f7   : > { %p773_p1 = pnand %p772_p0, %p766_p9 }
 0x1f9   : > { %776 = shalt.err (!%p773_p1)
}
 0x1fa   : > { %s831_s7 = smov 128   ;;  %s832_s8 = smov 8  }
 0x1fb   : > { %683 = dma.vmem_to_hbm [thread:$0]  (%p903_p4), %s1001_s29, 512, %s1006_s21, %s1008_s10, %s831_s7, %s831_s7, %s832_s8  }
 0x1fc PF: > { %p689_p2 = scmp.ge.s32.totalorder %s827_s23, 2  ;;  %s557_s9 = sand.u32 1, %s807_s18  }
 0x1fd   : > { %s558_s11 = scalar_lea.sflag [#allocation3], %s557_s9 }
 0x1fe   : > { %p686_p3 = pnand %p689_p2, %p910_p8 }
 0x200   : > { %802 = dma.done.wait (!%p686_p3), %s558_s11, 512  }
 0x201   : > { %804 = vsyncadd (!%p686_p3), %s558_s11, 4294966784  ;;  %s18_s23 = sadd.s32 1, %s827_s23   ;;  %s1062_s18 = smov %s811_s19 }
 0x202   : > { %p15_p5 = scmp.ge.s32.totalorder %s18_s23, 4   ;;  %s1063_s19 = smov %s815_s20 }
 0x203   : > { %s1064_s20 = smov %s916_s6  ;;  %s1065_s21 = smov %s823_s22 }
 0x204   : > { %s1066_s22 = smov %s1068_s26  ;;  %17 = sbr.rel (!%p15_p5) target bundleno = 4 (0x4), region = 75 }
 0x20b   :  { %563 = vsyncpa [#allocation3], 1 }
 0x20c   :  { %565 = vsyncpa [#allocation3 + $0x1], 1 }

</bundles_post_ra>
